<compile_context>
chip_gen: v5e
topology: v5e:2x2
jax: 0.10.0
libtpu: 0.0.40
codegen_flags: <defaults>
</compile_context>

<pallas_src>
import jax
import jax.numpy as jnp
from jax import lax
from jax.experimental import pallas as pl
from jax.experimental.pallas import tpu as pltpu

# ---- static hyperparameters (mirror the module __init__ / docstring example) ----
GAMMA = 2          # focal gamma (kernel hard-codes the square below)
SMOOTH = 1e-4      # DiceLoss smooth
W_FOCAL = 0.75
W_DICE = 0.25
LANE = 128
SUBLANE = 8


def _round_up(x, m):
    return ((x + m - 1) // m) * m


def _focal_dice_partial_kernel(logits_ref, target_ref, alpha_ref, out_ref,
                               sp_acc, sy_acc, spy_acc, fsum_acc):
    """One (C, T) tile: softmax over classes, focal + dice partial sums.

    Grid = (segments, tiles-per-segment).  Scratch accumulators carry over the
    inner (arbitrary) tile axis and are flushed into the per-segment output slab
    at the last tile of each segment.
    """
    t = pl.program_id(1)

    @pl.when(t == 0)
    def _init():
        sp_acc[...] = jnp.zeros_like(sp_acc)
        sy_acc[...] = jnp.zeros_like(sy_acc)
        spy_acc[...] = jnp.zeros_like(spy_acc)
        fsum_acc[...] = jnp.zeros_like(fsum_acc)

    x = logits_ref[...].astype(jnp.float32)      # (C, T)  classes on sublanes
    tgt = target_ref[...]                        # (1, T)  int32, -1 for padded cols
    alpha = alpha_ref[...].astype(jnp.float32)   # (C, 1)
    C, T = x.shape

    # --- softmax over classes (sublane axis); log_softmax is never materialised ---
    m = jnp.max(x, axis=0, keepdims=True)        # (1, T)
    sh = x - m
    e = jnp.exp(sh)
    z = jnp.sum(e, axis=0, keepdims=True)        # (1, T)
    inv_z = 1.0 / z                              # exact; only T divides per tile
    p = e * inv_z                                # softmax
    logz = jnp.log(z)                            # (1, T)

    # --- one-hot as a bool mask; padded cols (tgt = -1) -> all False ---
    cls = lax.broadcasted_iota(jnp.int32, (C, T), 0)
    y_mask = cls == tgt                          # (C, T) bool

    py = jnp.where(y_mask, p, 0.0)               # p * one_hot   (shared with dice)
    ya = jnp.where(y_mask, alpha, 0.0)           # alpha folded into the select
    yf = jnp.where(y_mask, 1.0, 0.0)             # one_hot as f32 (for S_y)

    # --- focal term: logpt*at = sh[t]*alpha[t] - log(z)*alpha[t] ---
    pt = jnp.sum(py, axis=0, keepdims=True)                 # (1, T)  p[n, t_n]
    a_t = jnp.sum(ya, axis=0, keepdims=True)                # (1, T)  alpha[t_n]
    s1 = jnp.sum(sh * ya, axis=0, keepdims=True)            # (1, T)
    logpt_at = s1 - logz * a_t                               # (1, T)
    one_m = 1.0 - pt
    focal = -(one_m * one_m) * logpt_at                      # gamma == 2

    # --- streaming accumulators (per segment) ---
    fsum_acc[...] += jnp.sum(focal, axis=1, keepdims=True)   # (1, 1)
    sp_acc[...] += jnp.sum(p, axis=1, keepdims=True)         # (C, 1); pad fixed in epilogue
    sy_acc[...] += jnp.sum(yf, axis=1, keepdims=True)        # (C, 1)
    spy_acc[...] += jnp.sum(py, axis=1, keepdims=True)       # (C, 1)

    # --- flush once per segment into the partial-sum slab ---
    @pl.when(t == pl.num_programs(1) - 1)
    def _flush():
        out_ref[...] = jnp.zeros_like(out_ref)               # (C_pad, 128)
        out_ref[0:C, 0:1] = sp_acc[...]
        out_ref[0:C, 1:2] = sy_acc[...]
        out_ref[0:C, 2:3] = spy_acc[...]
        out_ref[0:1, 3:4] = fsum_acc[...]


def focal_dice_loss(logits, target, alpha, *, tile_n=32768, n_seg=2):
    """logits: (N, C) float (f32 or bf16), target: (N,) int, alpha: (C,) float -> scalar f32.

    tile_n: examples per grid tile (lane-aligned; sweep 8k..64k on real shapes).
    n_seg:  parallel segments (>=2 lets v7x use both TensorCores; clamped to #tiles).
    """
    N, C = logits.shape
    tn = _round_up(max(min(tile_n, N), 1), LANE)      # lane-aligned example tile
    total_tiles = -(-N // tn)
    n_seg = max(1, min(n_seg, total_tiles))
    tiles_per_seg = -(-total_tiles // n_seg)
    n_pad = n_seg * tiles_per_seg * tn
    pad = n_pad - N
    c_pad = _round_up(C, SUBLANE)

    # Single fused pad (+transpose) instead of zeros+scatter.  INVARIANT: padded
    # example columns have exactly-zero logits (softmax = 1/C, corrected below)
    # and target sentinel -1 (one-hot all zero).  Logits stay in native dtype.
    logits_t = jnp.pad(logits, ((0, pad), (0, 0))).T                      # (C, n_pad)
    target_t = jnp.pad(target.astype(jnp.int32), (0, pad),
                       constant_values=-1).reshape(1, n_pad)              # (1, n_pad)
    alpha_c = jnp.asarray(alpha, jnp.float32).reshape(C, 1)

    slab = pl.pallas_call(
        _focal_dice_partial_kernel,
        out_shape=jax.ShapeDtypeStruct((n_seg * c_pad, LANE), jnp.float32),
        grid_spec=pltpu.PrefetchScalarGridSpec(
            num_scalar_prefetch=0,
            grid=(n_seg, tiles_per_seg),
            in_specs=[
                pl.BlockSpec((C, tn), lambda s, t: (0, s * tiles_per_seg + t)),  # logits
                pl.BlockSpec((1, tn), lambda s, t: (0, s * tiles_per_seg + t)),  # targets
                pl.BlockSpec((C, 1), lambda s, t: (0, 0)),                       # alpha
            ],
            out_specs=pl.BlockSpec((c_pad, LANE), lambda s, t: (s, 0)),
            scratch_shapes=[
                pltpu.VMEM((C, 1), jnp.float32),   # S_p
                pltpu.VMEM((C, 1), jnp.float32),   # S_y
                pltpu.VMEM((C, 1), jnp.float32),   # S_py
                pltpu.VMEM((1, 1), jnp.float32),   # focal sum
            ],
        ),
        compiler_params=pltpu.CompilerParams(
            dimension_semantics=("parallel", "arbitrary"),
            vmem_limit_bytes=32 * 1024 * 1024,     # ~10 MiB used at tn=32768
        ),
    )(logits_t, target_t, alpha_c)

    # ---- tiny JAX epilogue: combine per-segment partials, finalize focal + dice ----
    comb = slab.reshape(n_seg, c_pad, LANE).sum(axis=0)        # (C_pad, 128)
    s_p = comb[:C, 0] - (pad / C)        # analytic pad correction (zero logits -> 1/C)
    s_y = comb[:C, 1]
    s_py = comb[:C, 2]
    fsum = comb[0, 3]

    nf = float(N)
    den = s_p + s_y + SMOOTH                                   # (C,)
    num = 2.0 * s_py + nf * SMOOTH                             # (C,)
    dice = (nf * C - jnp.sum(num / den)) / nf
    return W_FOCAL * (fsum / nf) + W_DICE * dice


def reference(logits, target, alpha):
    """Pure-JAX reference mirroring the PyTorch forward (multi-class path)."""
    N, C = logits.shape
    p = jax.nn.softmax(logits, axis=1)
    logp = jax.nn.log_softmax(logits, axis=1)
    idx = jnp.arange(N)
    pt = p[idx, target]
    logpt = logp[idx, target]
    at = alpha[target]
    focal = -((1.0 - pt) ** GAMMA) * (logpt * at)                    # (N,)
    y = jax.nn.one_hot(target, C, dtype=jnp.float32)
    dice_per_row = jnp.sum(
        1.0 - (2.0 * p * y + SMOOTH) / (p.sum(0) + y.sum(0) + SMOOTH), axis=-1)
    dice = dice_per_row.mean()
    return (W_FOCAL * focal + W_DICE * dice).mean()


if __name__ == "__main__":
    key = jax.random.PRNGKey(0)
    k1, k2 = jax.random.split(key)
    N, C = 300, 7                                   # small (N, C) logits, (N,) labels
    logits = jax.random.normal(k1, (N, C), dtype=jnp.float32)
    target = jax.random.randint(k2, (N,), 0, C, dtype=jnp.int32)
    alpha = 0.5 + 0.1 * jnp.arange(C, dtype=jnp.float32)   # non-trivial per-class alpha

    ref = reference(logits, target, alpha)

    # Small tiles + 2 segments: exercises the parallel axis, in-segment accumulation,
    # the per-segment flush, and the analytic padded-column correction.
    out = focal_dice_loss(logits, target, alpha, tile_n=128, n_seg=2)
    out = jax.block_until_ready(out)
    assert jnp.allclose(out, ref, rtol=1e-5, atol=1e-5), (out, ref)

    # Default (large-tile) configuration: single tile / single segment at this N.
    out2 = jax.block_until_ready(focal_dice_loss(logits, target, alpha))
    assert jnp.allclose(out2, ref, rtol=1e-5, atol=1e-5), (out2, ref)

    print("KERNEL_OK")
</pallas_src>

<mosaic_0001>
module attributes {stable_mosaic.version = 11 : i64} {
  func.func @_focal_dice_partial_kernel(%arg0: i32, %arg1: i32, %arg2: memref<7x128xf32, #tpu.memory_space<vmem>>, %arg3: memref<1x128xi32, #tpu.memory_space<vmem>>, %arg4: memref<7x1xf32, #tpu.memory_space<vmem>>, %arg5: memref<8x128xf32, #tpu.memory_space<vmem>>, %arg6: memref<7x1xf32, #tpu.memory_space<vmem>>, %arg7: memref<7x1xf32, #tpu.memory_space<vmem>>, %arg8: memref<7x1xf32, #tpu.memory_space<vmem>>, %arg9: memref<1x1xf32, #tpu.memory_space<vmem>>) attributes {dimension_semantics = [#tpu.dimension_semantics<parallel>, #tpu.dimension_semantics<arbitrary>], iteration_bounds = array<i64: 2, 2>, scalar_prefetch = 0 : i64, scratch_operands = 4 : i64, tpu.core_type = #tpu.core_type<tc>, window_params = [{transform_indices = @transform_0, window_bounds = array<i64: 7, 128>}, {transform_indices = @transform_1, window_bounds = array<i64: 1, 128>}, {pipeline_mode = #tpu.pipeline_mode<synchronous>, transform_indices = @transform_2, window_bounds = array<i64: 7, 1>}, {transform_indices = @transform_3, window_bounds = array<i64: 8, 128>}]} {
    %c0_i32 = arith.constant 0 : i32
    %0 = arith.cmpi eq, %arg1, %c0_i32 : i32
    %1 = arith.extui %0 : i1 to i32
    %c0_i32_0 = arith.constant 0 : i32
    %2 = arith.cmpi ne, %1, %c0_i32_0 : i32
    scf.if %2 {
      %cst_38 = arith.constant 0.000000e+00 : f32
      %68 = vector.broadcast %cst_38 : f32 to vector<7x1xf32>
      %c0_39 = arith.constant 0 : index
      %c0_40 = arith.constant 0 : index
      %69 = vector.load %arg6[%c0_39, %c0_40] : memref<7x1xf32, #tpu.memory_space<vmem>>, vector<7x1xf32>
      tpu.vector_store %arg6[%c0_39, %c0_40], %68 {strides = array<i32>} : memref<7x1xf32, #tpu.memory_space<vmem>>, vector<7x1xf32>,
      %cst_41 = arith.constant 0.000000e+00 : f32
      %70 = vector.broadcast %cst_41 : f32 to vector<7x1xf32>
      %c0_42 = arith.constant 0 : index
      %c0_43 = arith.constant 0 : index
      %71 = vector.load %arg7[%c0_42, %c0_43] : memref<7x1xf32, #tpu.memory_space<vmem>>, vector<7x1xf32>
      tpu.vector_store %arg7[%c0_42, %c0_43], %70 {strides = array<i32>} : memref<7x1xf32, #tpu.memory_space<vmem>>, vector<7x1xf32>,
      %cst_44 = arith.constant 0.000000e+00 : f32
      %72 = vector.broadcast %cst_44 : f32 to vector<7x1xf32>
      %c0_45 = arith.constant 0 : index
      %c0_46 = arith.constant 0 : index
      %73 = vector.load %arg8[%c0_45, %c0_46] : memref<7x1xf32, #tpu.memory_space<vmem>>, vector<7x1xf32>
      tpu.vector_store %arg8[%c0_45, %c0_46], %72 {strides = array<i32>} : memref<7x1xf32, #tpu.memory_space<vmem>>, vector<7x1xf32>,
      %cst_47 = arith.constant 0.000000e+00 : f32
      %74 = vector.broadcast %cst_47 : f32 to vector<1x1xf32>
      %c0_48 = arith.constant 0 : index
      %c0_49 = arith.constant 0 : index
      %75 = vector.load %arg9[%c0_48, %c0_49] : memref<1x1xf32, #tpu.memory_space<vmem>>, vector<1x1xf32>
      tpu.vector_store %arg9[%c0_48, %c0_49], %74 {strides = array<i32>} : memref<1x1xf32, #tpu.memory_space<vmem>>, vector<1x1xf32>,
    } else {
    }
    %c0 = arith.constant 0 : index
    %c0_1 = arith.constant 0 : index
    %3 = vector.load %arg2[%c0, %c0_1] : memref<7x128xf32, #tpu.memory_space<vmem>>, vector<7x128xf32>
    %c0_2 = arith.constant 0 : index
    %c0_3 = arith.constant 0 : index
    %4 = vector.load %arg3[%c0_2, %c0_3] : memref<1x128xi32, #tpu.memory_space<vmem>>, vector<1x128xi32>
    %c0_4 = arith.constant 0 : index
    %c0_5 = arith.constant 0 : index
    %5 = vector.load %arg4[%c0_4, %c0_5] : memref<7x1xf32, #tpu.memory_space<vmem>>, vector<7x1xf32>
    %cst = arith.constant dense<0xFF800000> : vector<128xf32>
    %6 = vector.multi_reduction <maximumf>, %3, %cst [0] : vector<7x128xf32> to vector<128xf32>
    %7 = vector.shape_cast %6 : vector<128xf32> to vector<1x128xf32>
    %8 = vector.broadcast %7 : vector<1x128xf32> to vector<7x128xf32>
    %9 = arith.subf %3, %8 : vector<7x128xf32>
    %10 = math.exp %9 : vector<7x128xf32>
    %cst_6 = arith.constant dense<0.000000e+00> : vector<128xf32>
    %11 = vector.multi_reduction <add>, %10, %cst_6 [0] : vector<7x128xf32> to vector<128xf32>
    %12 = vector.shape_cast %11 : vector<128xf32> to vector<1x128xf32>
    %cst_7 = arith.constant 1.000000e+00 : f32
    %13 = vector.broadcast %cst_7 : f32 to vector<1x128xf32>
    %14 = arith.divf %13, %12 : vector<1x128xf32>
    %15 = vector.broadcast %14 : vector<1x128xf32> to vector<7x128xf32>
    %16 = arith.mulf %10, %15 : vector<7x128xf32>
    %17 = math.log %12 : vector<1x128xf32>
    %18 = tpu.iota {dimensions = array<i32: 0>} : vector<7x128xi32>
    %19 = vector.broadcast %4 : vector<1x128xi32> to vector<7x128xi32>
    %20 = arith.cmpi eq, %18, %19 : vector<7x128xi32>
    %cst_8 = arith.constant 0.000000e+00 : f32
    %21 = vector.broadcast %cst_8 : f32 to vector<7x128xf32>
    %22 = arith.select %20, %16, %21 : vector<7x128xi1>, vector<7x128xf32>
    %cst_9 = arith.constant 0.000000e+00 : f32
    %23 = vector.shape_cast %5 : vector<7x1xf32> to vector<7x1xf32>
    %24 = vector.broadcast %23 : vector<7x1xf32> to vector<7x128xf32>
    %25 = vector.broadcast %cst_9 : f32 to vector<7x128xf32>
    %26 = arith.select %20, %24, %25 : vector<7x128xi1>, vector<7x128xf32>
    %cst_10 = arith.constant 1.000000e+00 : f32
    %cst_11 = arith.constant 0.000000e+00 : f32
    %27 = vector.broadcast %cst_10 : f32 to vector<7x128xf32>
    %28 = vector.broadcast %cst_11 : f32 to vector<7x128xf32>
    %29 = arith.select %20, %27, %28 : vector<7x128xi1>, vector<7x128xf32>
    %cst_12 = arith.constant dense<0.000000e+00> : vector<128xf32>
    %30 = vector.multi_reduction <add>, %22, %cst_12 [0] : vector<7x128xf32> to vector<128xf32>
    %31 = vector.shape_cast %30 : vector<128xf32> to vector<1x128xf32>
    %cst_13 = arith.constant dense<0.000000e+00> : vector<128xf32>
    %32 = vector.multi_reduction <add>, %26, %cst_13 [0] : vector<7x128xf32> to vector<128xf32>
    %33 = vector.shape_cast %32 : vector<128xf32> to vector<1x128xf32>
    %34 = arith.mulf %9, %26 : vector<7x128xf32>
    %cst_14 = arith.constant dense<0.000000e+00> : vector<128xf32>
    %35 = vector.multi_reduction <add>, %34, %cst_14 [0] : vector<7x128xf32> to vector<128xf32>
    %36 = vector.shape_cast %35 : vector<128xf32> to vector<1x128xf32>
    %37 = arith.mulf %17, %33 : vector<1x128xf32>
    %38 = arith.subf %36, %37 : vector<1x128xf32>
    %cst_15 = arith.constant 1.000000e+00 : f32
    %39 = vector.broadcast %cst_15 : f32 to vector<1x128xf32>
    %40 = arith.subf %39, %31 : vector<1x128xf32>
    %41 = arith.mulf %40, %40 : vector<1x128xf32>
    %cst_16 = arith.constant 0.000000e+00 : f32
    %42 = vector.broadcast %cst_16 : f32 to vector<1x128xf32>
    %43 = arith.subf %42, %41 : vector<1x128xf32>
    %44 = arith.mulf %43, %38 : vector<1x128xf32>
    %c0_17 = arith.constant 0 : index
    %c0_18 = arith.constant 0 : index
    %45 = vector.load %arg9[%c0_17, %c0_18] : memref<1x1xf32, #tpu.memory_space<vmem>>, vector<1x1xf32>
    %cst_19 = arith.constant dense<0.000000e+00> : vector<1xf32>
    %46 = vector.multi_reduction <add>, %44, %cst_19 [1] : vector<1x128xf32> to vector<1xf32>
    %47 = vector.shape_cast %46 : vector<1xf32> to vector<1x1xf32>
    %48 = arith.addf %45, %47 : vector<1x1xf32>
    %c0_20 = arith.constant 0 : index
    %c0_21 = arith.constant 0 : index
    %49 = vector.load %arg9[%c0_20, %c0_21] : memref<1x1xf32, #tpu.memory_space<vmem>>, vector<1x1xf32>
    tpu.vector_store %arg9[%c0_20, %c0_21], %48 {strides = array<i32>} : memref<1x1xf32, #tpu.memory_space<vmem>>, vector<1x1xf32>,
    %c0_22 = arith.constant 0 : index
    %c0_23 = arith.constant 0 : index
    %50 = vector.load %arg6[%c0_22, %c0_23] : memref<7x1xf32, #tpu.memory_space<vmem>>, vector<7x1xf32>
    %cst_24 = arith.constant dense<0.000000e+00> : vector<7xf32>
    %51 = vector.multi_reduction <add>, %16, %cst_24 [1] : vector<7x128xf32> to vector<7xf32>
    %52 = vector.shape_cast %51 : vector<7xf32> to vector<7x1xf32>
    %53 = arith.addf %50, %52 : vector<7x1xf32>
    %c0_25 = arith.constant 0 : index
    %c0_26 = arith.constant 0 : index
    %54 = vector.load %arg6[%c0_25, %c0_26] : memref<7x1xf32, #tpu.memory_space<vmem>>, vector<7x1xf32>
    tpu.vector_store %arg6[%c0_25, %c0_26], %53 {strides = array<i32>} : memref<7x1xf32, #tpu.memory_space<vmem>>, vector<7x1xf32>,
    %c0_27 = arith.constant 0 : index
    %c0_28 = arith.constant 0 : index
    %55 = vector.load %arg7[%c0_27, %c0_28] : memref<7x1xf32, #tpu.memory_space<vmem>>, vector<7x1xf32>
    %cst_29 = arith.constant dense<0.000000e+00> : vector<7xf32>
    %56 = vector.multi_reduction <add>, %29, %cst_29 [1] : vector<7x128xf32> to vector<7xf32>
    %57 = vector.shape_cast %56 : vector<7xf32> to vector<7x1xf32>
    %58 = arith.addf %55, %57 : vector<7x1xf32>
    %c0_30 = arith.constant 0 : index
    %c0_31 = arith.constant 0 : index
    %59 = vector.load %arg7[%c0_30, %c0_31] : memref<7x1xf32, #tpu.memory_space<vmem>>, vector<7x1xf32>
    tpu.vector_store %arg7[%c0_30, %c0_31], %58 {strides = array<i32>} : memref<7x1xf32, #tpu.memory_space<vmem>>, vector<7x1xf32>,
    %c0_32 = arith.constant 0 : index
    %c0_33 = arith.constant 0 : index
    %60 = vector.load %arg8[%c0_32, %c0_33] : memref<7x1xf32, #tpu.memory_space<vmem>>, vector<7x1xf32>
    %cst_34 = arith.constant dense<0.000000e+00> : vector<7xf32>
    %61 = vector.multi_reduction <add>, %22, %cst_34 [1] : vector<7x128xf32> to vector<7xf32>
    %62 = vector.shape_cast %61 : vector<7xf32> to vector<7x1xf32>
    %63 = arith.addf %60, %62 : vector<7x1xf32>
    %c0_35 = arith.constant 0 : index
    %c0_36 = arith.constant 0 : index
    %64 = vector.load %arg8[%c0_35, %c0_36] : memref<7x1xf32, #tpu.memory_space<vmem>>, vector<7x1xf32>
    tpu.vector_store %arg8[%c0_35, %c0_36], %63 {strides = array<i32>} : memref<7x1xf32, #tpu.memory_space<vmem>>, vector<7x1xf32>,
    %c1_i32 = arith.constant 1 : i32
    %65 = arith.cmpi eq, %arg1, %c1_i32 : i32
    %66 = arith.extui %65 : i1 to i32
    %c0_i32_37 = arith.constant 0 : i32
    %67 = arith.cmpi ne, %66, %c0_i32_37 : i32
    scf.if %67 {
      %cst_38 = arith.constant 0.000000e+00 : f32
      %68 = vector.broadcast %cst_38 : f32 to vector<8x128xf32>
      %c0_39 = arith.constant 0 : index
      %c0_40 = arith.constant 0 : index
      %69 = vector.load %arg5[%c0_39, %c0_40] : memref<8x128xf32, #tpu.memory_space<vmem>>, vector<8x128xf32>
      tpu.vector_store %arg5[%c0_39, %c0_40], %68 {strides = array<i32>} : memref<8x128xf32, #tpu.memory_space<vmem>>, vector<8x128xf32>,
      %c0_41 = arith.constant 0 : index
      %c0_42 = arith.constant 0 : index
      %70 = vector.load %arg6[%c0_41, %c0_42] : memref<7x1xf32, #tpu.memory_space<vmem>>, vector<7x1xf32>
      %c0_43 = arith.constant 0 : index
      %c0_44 = arith.constant 0 : index
      %71 = vector.load %arg5[%c0_43, %c0_44] : memref<8x128xf32, #tpu.memory_space<vmem>>, vector<7x1xf32>
      tpu.vector_store %arg5[%c0_43, %c0_44], %70 {strides = array<i32>} : memref<8x128xf32, #tpu.memory_space<vmem>>, vector<7x1xf32>,
      %c0_45 = arith.constant 0 : index
      %c0_46 = arith.constant 0 : index
      %72 = vector.load %arg7[%c0_45, %c0_46] : memref<7x1xf32, #tpu.memory_space<vmem>>, vector<7x1xf32>
      %c0_47 = arith.constant 0 : index
      %c1 = arith.constant 1 : index
      %73 = vector.load %arg5[%c0_47, %c1] : memref<8x128xf32, #tpu.memory_space<vmem>>, vector<7x1xf32>
      tpu.vector_store %arg5[%c0_47, %c1], %72 {strides = array<i32>} : memref<8x128xf32, #tpu.memory_space<vmem>>, vector<7x1xf32>,
      %c0_48 = arith.constant 0 : index
      %c0_49 = arith.constant 0 : index
      %74 = vector.load %arg8[%c0_48, %c0_49] : memref<7x1xf32, #tpu.memory_space<vmem>>, vector<7x1xf32>
      %c0_50 = arith.constant 0 : index
      %c2 = arith.constant 2 : index
      %75 = vector.load %arg5[%c0_50, %c2] : memref<8x128xf32, #tpu.memory_space<vmem>>, vector<7x1xf32>
      tpu.vector_store %arg5[%c0_50, %c2], %74 {strides = array<i32>} : memref<8x128xf32, #tpu.memory_space<vmem>>, vector<7x1xf32>,
      %c0_51 = arith.constant 0 : index
      %c0_52 = arith.constant 0 : index
      %76 = vector.load %arg9[%c0_51, %c0_52] : memref<1x1xf32, #tpu.memory_space<vmem>>, vector<1x1xf32>
      %c0_53 = arith.constant 0 : index
      %c3 = arith.constant 3 : index
      %77 = vector.load %arg5[%c0_53, %c3] : memref<8x128xf32, #tpu.memory_space<vmem>>, vector<1x1xf32>
      tpu.vector_store %arg5[%c0_53, %c3], %76 {strides = array<i32>} : memref<8x128xf32, #tpu.memory_space<vmem>>, vector<1x1xf32>,
    } else {
    }
    return
  }
  func.func @transform_0(%arg0: i32, %arg1: i32) -> (i32, i32) {
    %c2_i32 = arith.constant 2 : i32
    %0 = arith.muli %arg0, %c2_i32 : i32
    %1 = arith.addi %0, %arg1 : i32
    %c0_i32 = arith.constant 0 : i32
    %c0_i32_0 = arith.constant 0 : i32
    return %c0_i32, %1 : i32, i32
  }
  func.func @transform_1(%arg0: i32, %arg1: i32) -> (i32, i32) {
    %c2_i32 = arith.constant 2 : i32
    %0 = arith.muli %arg0, %c2_i32 : i32
    %1 = arith.addi %0, %arg1 : i32
    %c0_i32 = arith.constant 0 : i32
    %c0_i32_0 = arith.constant 0 : i32
    return %c0_i32, %1 : i32, i32
  }
  func.func @transform_2(%arg0: i32, %arg1: i32) -> (i32, i32) {
    %c0_i32 = arith.constant 0 : i32
    %c0_i32_0 = arith.constant 0 : i32
    %c0_i32_1 = arith.constant 0 : i32
    return %c0_i32, %c0_i32_0 : i32, i32
  }
  func.func @transform_3(%arg0: i32, %arg1: i32) -> (i32, i32) {
    %c0_i32 = arith.constant 0 : i32
    %c0_i32_0 = arith.constant 0 : i32
    return %arg0, %c0_i32 : i32, i32
  }
}

</mosaic_0001>

<bundles_post_ra>
// kernel: tpu_custom_call.1
= control target key start
LH: loop header
LB: loop body
LE: loop exit
PB: predicated region body
PF: predicated region fallthrough
CT: control target
= control target key end

     0   :  { %8 = vsyncpa [#allocation7], 0  ;;  %s1022_s0 = inlined_call_operand.hbm [shape: f32[7,512], index: 0, kind: input, shape index: {}]   ;;  %s1023_s1 = inlined_call_operand.vmem [shape: s32[1,512], index: 1, kind: input, shape index: {}]   ;;  %s1024_s2 = inlined_call_operand.vmem [shape: f32[7,1], index: 2, kind: input, shape index: {}]   ;;  %s1025_s3 = inlined_call_operand.hbm [shape: f32[16,128], index: 3, kind: output, shape index: {}]  }
   0x1   :  { %10 = vsyncpa [#allocation7 + $0x1], 0 }
   0x2   :  { %11 = vsyncpa [#allocation8], 0 }
   0x3   :  { %13 = vsyncpa [#allocation8 + $0x1], 0  ;;  %s806_s12 = smov 0   ;;  %s808_s13 = smov 0  }
   0x4   :  { %s810_s14 = smov 0   ;;  %s812_s15 = smov 0  }
   0x5   :  { %s814_s16 = smov 0   ;;  %s816_s17 = smov 0  }
   0x6   :  { %s818_s18 = smov 0   ;;  %s820_s19 = smov 0  }
   0x7   :  { %s822_s20 = smov 0   ;;  %s824_s21 = smov 0  }
   0x8   :  { %s826_s22 = smov 0  }
   0x9 LB: > { %1030 = sst [smem:[#allocation12_spill]] %s769_s20  ;;  %s486_s23 = sadd.s32 4294967295, %s777_s22   ;;  %s777_s22 = sphi %s826_s22, %s19_s22   ;;  %s773_s21 = sphi %s824_s21, %s1041_s21   ;;  %s769_s20 = sphi %s822_s20, %s1040_s20   ;;  %s765_s19 = sphi %s820_s19, %s1039_s19   ;;  %s761_s18 = sphi %s818_s18, %s1038_s18   ;;  %s757_s17 = sphi %s816_s17, %s1047_s17   ;;  %s753_s16 = sphi %s814_s16, %s1046_s16   ;;  %s749_s15 = sphi %s812_s15, %s1045_s15   ;;  %s745_s14 = sphi %s810_s14, %s1044_s14   ;;  %s741_s13 = sphi %s808_s13, %s1043_s13   ;;  %s737_s12 = sphi %s806_s12, %s1042_s12  }
   0xa   : > { %1031 = sst [smem:[#allocation13_spill]] %s773_s21  ;;  %s487_s24 = sadd.s32 4294967294, %s777_s22  }
   0xb   : > { %s28_s25 = sadd.s32 1, %s769_s20  ;;  %s31_s26 = sadd.s32 1, %s773_s21 }
   0xc   : > { %p29_p0 = scmp.ge.s32.totalorder %s28_s25, 2  ;;  %s488_s27 = sshll.u32 %s773_s21, 1 }
   0xd   : > { %s865_s28 = sadd.s32 %s769_s20, %s488_s27  ;;  %s42_s29 = sadd.s32 1, %s757_s17 }
   0xe   : > { %s1049_s25 = smov (%p29_p0, %s28_s25), 0  ;;  %s1051_s26 = smov (!%p29_p0, %s31_s26), %s773_s21 }
   0xf   : > { %1032 = sst [smem:[#allocation14_spill]] %s1049_s25  ;;  %p49_p1 = scmp.ne.s32.totalorder %s757_s17, %s753_s16 }
  0x10   : > { %p50_p2 = scmp.eq.s32.totalorder %s777_s22, 0  ;;  %p33_p3 = scmp.ge.s32.totalorder %s1051_s26, 2 }
  0x11   : > { %p55_p4 = scmp.ne.s32.totalorder %s753_s16, %s749_s15  ;;  %p56_p6 = scmp.eq.s32.totalorder %s486_s23, 0 }
  0x12   : > { %p875_p5 = por %p50_p2, %p49_p1  ;;  %s1053_s26 = smov (%p33_p3, %s1051_s26), 0 }
  0x13   : > { %1034 = sst [smem:[#allocation15_spill]] %s1053_s26  ;;  %p881_p7 = por %p56_p6, %p55_p4 }
  0x14   : > { %s119_s5 = sadd.s32 1, %s745_s14  ;;  %s489_s6 = sshll.u32 %s1053_s26, 1 }
  0x15   : > { %s116_s7 = ssub.s32 %s773_s21, %s1053_s26  ;;  %s38_s8 = sadd.s32 %s489_s6, %s1049_s25 }
  0x16   : > { %p117_p8 = scmp.eq.s32.totalorder %s116_s7, 0  ;;  %s39_s9 = ssub.s32 %s865_s28, %s38_s8 }
  0x17   : > { %p129_p9 = scmp.ne.s32.totalorder %s745_s14, %s741_s13  ;;  %p40_p10 = scmp.eq.s32.totalorder %s39_s9, 0 }
  0x18   : > { %p130_p11 = scmp.eq.s32.totalorder %s486_s23, 3  ;;  %p135_p13 = scmp.ne.s32.totalorder %s741_s13, %s737_s12 }
  0x19   : > { %s894_s10 = scalar_select %p117_p8, %s745_s14, %s119_s5  }
  0x1a   : > { %s897_s11 = scalar_select %p40_p10, %s757_s17, %s42_s29  }
  0x1b   : > { %p899_p12 = por %p130_p11, %p129_p9  ;;  %p136_p0 = scmp.eq.s32.totalorder %s487_s24, 3 }
  0x1c   : > { %p519_p1 = scmp.lt.s32.totalorder %s777_s22, 4  ;;  %s159_s27 = sand.u32 1, %s757_s17  }
  0x1d   : > { %p909_p2 = por %p136_p0, %p135_p13  ;;  %s494_s23 = sshll.u32 %s159_s27, 3 }
  0x1e   : > { %s496_s5 = sshll.u32 %s865_s28, 3  ;;  %s163_s26 = scalar_lea.vmem [#allocation6], %s494_s23 }
  0x1f   : > { %s169_s8 = scalar_lea.hbm %s1022_s0, %s496_s5  ;;  %s173_s25 = sshll.u32 %s163_s26, 4  ;;  %s174_s25 = int_to_ptr.vmem [resolvable:$true] %s173_s25 }
  0x20   : > { %s171_s9 = sshll.u32 %s169_s8, 4  ;;  %p512_p3 = pnand %p519_p1, %p875_p5  ;;  %s172_s9 = int_to_ptr.hbm [resolvable:$true] %s171_s9 }
  0x21   : > { %p497_p4 = scmp.ge.s32.totalorder %s777_s22, 1  ;;  %p188_p6 = scmp.lt.s32.totalorder %s777_s22, 5 }
  0x22   : > { %s160_s24 = scalar_lea.sflag [#allocation7], %s159_s27 }
  0x23   : > { %514 = dma.hbm_to_vmem [thread:$0]  (!%p512_p3), %s172_s9, 128, %s174_s25, %s160_s24  }
  0x24   : > { %p189_p8 = pnand %p497_p4, %p188_p6 }
  0x25   : > { %s194_s28 = sand.u32 (!%p189_p8), 1, %s753_s16  }
  0x26   : > { %192 = sbr.rel (%p189_p8) target bundleno = 456 (0x1c8), region = 32  ;;  %s498_s21 = sshll.u32 (!%p189_p8), %s194_s28, 3 }
  0x27   : > { %s195_s20 = scalar_lea.sflag (!%p189_p8), [#allocation7], %s194_s28  ;;  %s198_s7 = scalar_lea.vmem (!%p189_p8), [#allocation6], %s498_s21 }
  0x2b   : > { %728 = dma.done.wait (%p881_p7), %s195_s20, 128  }
  0x2c   : > { %730 = vsyncadd (%p881_p7), %s195_s20, 4294967168  ;;  %s224_s26 = sand.u32 1, %s741_s13   ;;  %s500_s30 = sshll.u32 %s765_s19, 1 }
  0x2d   : > { %s499_s25 = sshll.u32 %s224_s26, 3  ;;  %s230_s27 = sadd.s32 %s761_s18, %s500_s30 }
  0x2e   : > { %p231_p5 = scmp.lt.s32.totalorder %s230_s27, 3  ;;  %s937_s29 = scalar_lea.vmem [#allocation9], %s499_s25 }
  0x2f   : > { %p501_p7 = scmp.ne.s32.totalorder %s761_s18, 0 }
  0x30   : > { %s1055_s27 = smov (!%p231_p5, %s230_s27), 3 }
  0x31   : > { %s233_s5 = scalar_lea.vmem %s1023_s1, %s1055_s27  ;;  %239 = sbr.rel (%p501_p7) target bundleno = 59 (0x3b), region = 40 }
  0x36   : > { %vm240_vm0 = vcmask 6144   ;;  %v779_v0 = vmov 0.0   ;;  %vm244_vm1 = vcmask 0  }
  0x37   : > { %241 = vst.msk [vmem:[#allocation2] sm:$0x7f] %vm240_vm0, %v779_v0 }
  0x38   : > { %242 = vst.msk [vmem:[#allocation3] sm:$0x7f] %vm240_vm0, %v779_v0 }
  0x39   : > { %243 = vst.msk [vmem:[#allocation4] sm:$0x7f] %vm240_vm0, %v779_v0 }
  0x3a   : > { %245 = vst.msk [vmem:[#allocation5] sm:$0x1] %vm244_vm1, %v779_v0 }
  0x3b PF: > { %v248_v1 = vld [vmem:[%s1024_s2] sm:$0x7f]  ;;  %v780_v2 = vmov 0   ;;  %vm249_vm2 = vcmask 1046528   ;;  %v285_v24 = vlaneseq  ;;  %v781_v38 = vmov 0.0   ;;  %p502_p9 = scmp.ne.s32.totalorder %s761_s18, 1 }
  0x3c   : > { %616 = vset.pattern.permute.xlu0 %v780_v2  ;;  %v246_v3 = vld [vmem:[%s198_s7] sm:$0x7f]  ;;  %v617_v32 = vld [vmem:[%s233_s5] ss:$0 sm:$0xff]  ;;  %vm336_vm8 = vcmask 6144   ;;  %vm329_vm9 = vcmask 0  }
  0x3d   : > { %292 = vperm.xlu0 %616, %v248_v1   ;;  %v250_v4 = vsel %vm249_vm2, %v246_v3, -inf  ;;  %v286_v29 = vshrl.u32 %v285_v24, 7  ;;  %s782_s24 = smov (!%p502_p9), 1   ;;  %s783_s28 = smov (!%p502_p9), 3  }
  0x3e   : > { %v251_v5 = vrot.slane %v250_v4, 4  ;;  %s784_s7 = smov (!%p502_p9), 2  }
  0x3f   : > { %vm288_vm7 = vcmp.eq.s32.totalorder %v286_v29, %v617_v32 }
  0x40   : > { %v252_v6 = vmax.f32 %v250_v4, %v251_v5  ;;  %v296_v39 = vsel %vm288_vm7, 1.0, %v781_v38 }
  0x41   : > { %v339_v41 = vsel %vm249_vm2, %v296_v39, 0.0 }
  0x42   : > { %v253_v7 = vrot.slane %v252_v6, 2 }
  0x44   : > { %v254_v8 = vmax.f32 %v252_v6, %v253_v7 }
  0x46   : > { %v255_v9 = vrot.slane %v254_v8, 1 }
  0x48   : > { %v256_v10 = vmax.f32 %v254_v8, %v255_v9  ;;  %v344_v8 = vld [vmem:[#allocation4] sm:$0x7f] }
  0x4a   : > { %v257_v11 = vsub.f32 %v246_v3, %v256_v10 }
  0x4c   : > { %v258_v12 = vmul.f32 1.442695, %v257_v11 }
  0x4e   : > { %618 = vpow2.f32 %v258_v12 }
  0x54   : > { %v619_v13 = vpop.eup %618 }
  0x55   : > { %v260_v14 = vsel %vm249_vm2, %v619_v13, 0.0 }
  0x56   : > { %v261_v15 = vrot.slane %v260_v14, 4 }
  0x58   : > { %v262_v16 = vadd.f32 %v261_v15, %v260_v14  ;;  %v338_v14 = vld [vmem:[#allocation3] sm:$0x7f] }
  0x5a   : > { %v263_v17 = vrot.slane %v262_v16, 2 }
  0x5c   : > { %v264_v18 = vadd.f32 %v263_v17, %v262_v16  ;;  %v325_v17 = vld [vmem:[#allocation5] sm:$0x1] }
  0x5e   : > { %v265_v19 = vrot.slane %v264_v18, 1 }
  0x60   : > { %v266_v20 = vadd.f32 %v265_v19, %v264_v18 }
  0x62   : > { %620 = vrcp.f32 %v266_v20  ;;  %v278_v26 = vand.u32 2147483648, %v266_v20  ;;  %vm272_vm3 = vweird.f32 %v266_v20  ;;  %v276_v28 = vand.u32 2147483647, %v266_v20 }
  0x63   : > { %622 = vlog2.f32 %v266_v20 }
  0x64   : > { %v279_v30 = vor.u32 1.1754944e-38, %v278_v26  ;;  %vm277_vm6 = vcmp.eq.f32.partialorder %v276_v28, 8.507059e+37 }
  0x68   : > { %v621_v21 = vpop.eup %620 }
  0x69   : > { %v268_v22 = vmul.f32 %v621_v21, %v266_v20  ;;  %vm273_vm4 = vweird.f32 %v621_v21  ;;  %v623_v58 = vpop.eup %622 }
  0x6a   : > { %vm274_vm5 = vmor %vm272_vm3, %vm273_vm4  ;;  %v284_v63 = vmul.f32 0.6931472, %v623_v58 }
  0x6b   : > { %v269_v23 = vsub.f32 1.0, %v268_v22 }
  0x6d   : > { %v270_v25 = vmul.f32 %v621_v21, %v269_v23 }
  0x6f   : > { %v271_v27 = vadd.f32 %v621_v21, %v270_v25 }
  0x71   : > { %v275_v31 = vsel %vm274_vm5, %v621_v21, %v271_v27 }
  0x72   : > { %v280_v33 = vsel %vm277_vm6, %v279_v30, %v275_v31 }
  0x73   : > { %v282_v34 = vmul.f32 %v619_v13, %v280_v33 }
  0x75   : > { %v289_v35 = vsel %vm288_vm7, %v282_v34, 0.0  ;;  %v332_v37 = vsel %vm249_vm2, %v282_v34, 0.0 }
  0x76   : > { %v297_v36 = vsel %vm249_vm2, %v289_v35, 0.0  ;;  %333 = vadd.xlane.f32.xlu1 %v332_v37 }
  0x77   : > { %345 = vadd.xlane.f32.xlu2 %v297_v36  ;;  %v298_v40 = vrot.slane %v297_v36, 4 }
  0x79   : > { %v299_v42 = vadd.f32 %v298_v40, %v297_v36 }
  0x7b   : > { %v300_v43 = vrot.slane %v299_v42, 2 }
  0x7d   : > { %v301_v44 = vadd.f32 %v300_v43, %v299_v42 }
  0x7e   : > { %340 = vadd.xlane.f32.xlu1 %v339_v41 }
  0x7f   : > { %v302_v45 = vrot.slane %v301_v44, 1 }
  0x81   : > { %v303_v51 = vadd.f32 %v302_v45, %v301_v44 }
  0x83   : > { %v321_v57 = vsub.f32 1.0, %v303_v51 }
  0x85   : > { %v322_v0 = vmul.f32 %v321_v57, %v321_v57 }
  0x87   : > { %v323_v5 = vsub.f32 0.0, %v322_v0 }
  0xaf   : > { %v293_v46 = vpop.permute.xlu0 %292 }
  0xb0   : > { %v295_v47 = vsel %vm288_vm7, %v293_v46, 0.0 }
  0xb1   : > { %v304_v48 = vsel %vm249_vm2, %v295_v47, 0.0  ;;  %v311_v49 = vmul.f32 %v295_v47, %v257_v11  ;;  %v331_v11 = vld [vmem:[#allocation2] sm:$0x7f] }
  0xb2   : > { %v305_v50 = vrot.slane %v304_v48, 4 }
  0xb3   : > { %v312_v52 = vsel %vm249_vm2, %v311_v49, 0.0 }
  0xb4   : > { %v306_v53 = vadd.f32 %v305_v50, %v304_v48  ;;  %v313_v54 = vrot.slane %v312_v52, 4 }
  0xb6   : > { %v307_v55 = vrot.slane %v306_v53, 2  ;;  %v314_v56 = vadd.f32 %v313_v54, %v312_v52 }
  0xb8   : > { %v308_v59 = vadd.f32 %v307_v55, %v306_v53  ;;  %v315_v60 = vrot.slane %v314_v56, 2 }
  0xba   : > { %v309_v61 = vrot.slane %v308_v59, 1  ;;  %v316_v62 = vadd.f32 %v315_v60, %v314_v56 }
  0xbc   : > { %v310_v1 = vadd.f32 %v309_v61, %v308_v59  ;;  %v317_v2 = vrot.slane %v316_v62, 1 }
  0xbe   : > { %v318_v3 = vadd.f32 %v317_v2, %v316_v62  ;;  %v319_v4 = vmul.f32 %v310_v1, %v284_v63 }
  0xc0   : > { %v320_v6 = vsub.f32 %v318_v3, %v319_v4 }
  0xc2   : > { %v324_v7 = vmul.f32 %v323_v5, %v320_v6 }
  0xc4   : > { %326 = vadd.xlane.f32.xlu0 %v324_v7 }
  0xe9   : > { %v334_v12 = vpop.xlane.xlu1 %333 }
  0xea   : > { %v346_v9 = vpop.xlane.xlu2 %345  ;;  %v335_v13 = vadd.f32 %v334_v12, %v331_v11 }
  0xeb   : > { %v347_v10 = vadd.f32 %v346_v9, %v344_v8 }
  0xec   : > { %337 = vst.msk [vmem:[#allocation2] sm:$0x7f] %vm336_vm8, %v335_v13 }
  0xed   : > { %348 = vst.msk [vmem:[#allocation4] sm:$0x7f] %vm336_vm8, %v347_v10 }
  0xf1   : > { %v341_v15 = vpop.xlane.xlu1 %340 }
  0xf2   : > { %v342_v16 = vadd.f32 %v341_v15, %v338_v14 }
  0xf4   : > { %343 = vst.msk [vmem:[#allocation3] sm:$0x7f] %vm336_vm8, %v342_v16 }
 0x136   : > { %352 = sbr.rel (%p502_p9) target bundleno = 441 (0x1b9), region = 44 }
 0x137   : > { %v327_v18 = vpop.xlane.xlu0 %326 }
 0x138   : > { %v328_v19 = vadd.f32 %v327_v18, %v325_v17 }
 0x13a   : > { %330 = vst.msk [vmem:[#allocation5] sm:$0x1] %vm329_vm9, %v328_v19 }
 0x13b   : > { %v356_v20 = vld [vmem:[#allocation3] sm:$0x7f]  ;;  %v363_v22 = vld [vmem:[#allocation4] sm:$0x7f]  ;;  %v785_v23 = vmov 0.0   ;;  %vm361_vm10 = vcmask 14344  }
 0x13c   : > { %358 = vrot.lane.b32.xlu0 %v356_v20, %s782_s24  ;;  %353 = vst [vmem:[%s937_s29] sm:$0xff] %v785_v23  ;;  %v354_v24 = vld [vmem:[#allocation2] sm:$0x7f]  ;;  %vm368_vm11 = vcmask 22544   ;;  %vm376_vm12 = vcmask 24600  }
 0x13d   : > { %355 = vst.msk [vmem:[%s937_s29] sm:$0x7f] %vm336_vm8, %v354_v24 }
 0x141   : > { %v624_v21 = vld [vmem:[#allocation5] ss:$0 sm:$0xff] }
 0x142   : > { %373 = vrot.lane.b32.xlu1 %v624_v21, %s783_s28 }
 0x144   : > { %365 = vrot.lane.b32.xlu0 %v363_v22, %s784_s7 }
 0x1ae   : > { %v359_v25 = vpop.permute.xlu0 %358 }
 0x1af   : > { %362 = vst.msk [vmem:[%s937_s29] sm:$0x7f] %vm361_vm10, %v359_v25 }
 0x1b4   : > { %v374_v26 = vpop.permute.xlu1 %373 }
 0x1b6   : > { %v366_v27 = vpop.permute.xlu0 %365 }
 0x1b7   : > { %369 = vst.msk [vmem:[%s937_s29] sm:$0x7f] %vm368_vm11, %v366_v27 }
 0x1b8   : > { %377 = vst.msk [vmem:[%s937_s29] sm:$0x1] %vm376_vm12, %v374_v26 }
 0x1b9 PF: > { %s504_s18 = sshll.u32 %s765_s19, 3  ;;  %s391_s23 = sshll.u32 %s937_s29, 4  ;;  %s392_s23 = int_to_ptr.vmem [resolvable:$true] %s391_s23 }
 0x1ba   : > { %s389_s27 = scalar_lea.hbm %s1025_s3, %s504_s18  ;;  %s379_s5 = scalar_lea.sflag [#allocation8], %s224_s26 }
 0x1bb   : > { %s393_s21 = sshll.u32 %s389_s27, 4  ;;  %s675_s19 = scalar_lea.hbm %s1025_s3, 16  ;;  %s394_s21 = int_to_ptr.hbm [resolvable:$true] %s393_s21 }
 0x1bc   : > { %s669_s20 = sshra.s32 %s394_s21, 4  ;;  %s670_s20 = int_to_ptr.hbm [resolvable:$true] %s669_s20 }
 0x1bd   : > { %s671_s4 = scalar_lea.hbm %s670_s20, 8  ;;  %p676_p0 = scmp.lt.s32.totalorder %s670_s20, %s1025_s3 }
 0x1be   : > { %p672_p10 = scmp.ne.s32.totalorder %s670_s20, %s671_s4  ;;  %p677_p1 = scmp.lt.s32.totalorder %s675_s19, %s671_s4 }
 0x1c0   : > { %p673_p11 = pnand %p672_p10, %p899_p12  ;;  %p678_p3 = por %p677_p1, %p676_p0 }
 0x1c2   : > { %p674_p13 = pneg %p673_p11 }
 0x1c4   : > { %p679_p4 = pnand %p678_p3, %p674_p13 }
 0x1c6   : > { %682 = shalt.err (!%p679_p4)
}
 0x1c7   : > { %509 = dma.vmem_to_hbm [thread:$0]  (%p899_p12), %s392_s23, 128, %s394_s21, %s379_s5  }
 0x1c8 PF: > { %p520_p6 = scmp.ge.s32.totalorder %s777_s22, 2  ;;  %s405_s26 = sand.u32 1, %s737_s12  }
 0x1c9   : > { %s406_s29 = scalar_lea.sflag [#allocation8], %s405_s26 }
 0x1ca   : > { %p516_p8 = pnand %p520_p6, %p909_p2 }
 0x1cc   : > { %p517_p5 = pneg %p516_p8 }
 0x1ce   : > { %732 = dma.done.wait (%p517_p5), %s406_s29, 128  }
 0x1cf   : > { %734 = vsyncadd (%p517_p5), %s406_s29, 4294967168  ;;  %s19_s22 = sadd.s32 1, %s777_s22   ;;  %s1038_s18 = sld [smem:[#allocation12_spill]] }
 0x1d0   : > { %p16_p7 = scmp.ge.s32.totalorder %s19_s22, 6   ;;  %s1039_s19 = sld [smem:[#allocation13_spill]] }
 0x1d1   : > { %s1040_s20 = sld [smem:[#allocation14_spill]]  ;;  %s1042_s12 = smov %s741_s13 }
 0x1d2   : > { %s1041_s21 = sld [smem:[#allocation15_spill]]  ;;  %s1043_s13 = smov %s745_s14 }
 0x1d3   : > { %s1044_s14 = smov %s894_s10  ;;  %s1045_s15 = smov %s753_s16 }
 0x1d4   : > { %s1046_s16 = smov %s757_s17  ;;  %s1047_s17 = smov %s897_s11 }
 0x1d5   :  { %18 = sbr.rel (!%p16_p7) target bundleno = 9 (0x9), region = 88 }
 0x1da   :  { %412 = vsyncpa [#allocation7], 1 }
 0x1db   :  { %414 = vsyncpa [#allocation7 + $0x1], 1 }
 0x1dc   :  { %415 = vsyncpa [#allocation8], 1 }
 0x1dd   :  { %417 = vsyncpa [#allocation8 + $0x1], 1 }

</bundles_post_ra>
